<compile_context>
chip_gen: v6e
topology: v6e:2x2x1
jax: 0.10.0
libtpu: 0.0.40
codegen_flags: <defaults>
</compile_context>

<pallas_src>
import functools
import math

import jax
import jax.numpy as jnp
from jax.experimental import pallas as pl
from jax.experimental.pallas import tpu as pltpu

_NEG_INF = -1e30  # finite sentinel (avoids inf-inf NaNs in the online softmax)


# --------------------------------------------------------------------------- #
# Tile selection / VMEM budgeting
# --------------------------------------------------------------------------- #
def _round_up(x, m):
    return -(-x // m) * m


def _vmem_estimate(TQ, TKV, D, H, hd):
    """Rough VMEM footprint (bytes) incl. (8,128) layout padding + 2x buffering."""
    f32b, bf16b = 4, 2
    hd_p = _round_up(hd, 128)
    d_p = _round_up(D, 128)
    tq_p = _round_up(TQ, 8)
    tkv_p8 = _round_up(TKV, 8)
    tkv_pl = _round_up(TKV, 128)
    est = 0
    est += 2 * tq_p * d_p * bf16b                  # q block (double-buffered)
    est += 2 * 2 * H * tkv_p8 * hd_p * bf16b       # Kh, Vh blocks (double-buffered)
    est += 2 * 8 * tkv_pl * f32b                   # mask block
    est += 2 * 2 * _round_up(D, 8) * d_p * bf16b   # wq_t, wp_t (double-buffered)
    est += 2 * 2 * 8 * d_p * f32b                  # bq, bp
    est += 2 * tq_p * d_p * f32b                   # output block (double-buffered)
    est += H * tq_p * hd_p * bf16b                 # cached head-major Q scratch
    est += 2 * H * tq_p * 128 * f32b               # m, l scratch
    est += H * tq_p * hd_p * f32b                  # acc scratch
    est += 3 * H * tq_p * tkv_pl * f32b            # live score temps (s, p, bf16 copy)
    return est


def _choose_tiles(L, M, D, H, q_tile=None, kv_tile=None, budget_bytes=40 << 20):
    """Pick (TQ, TKV) so the estimated footprint fits a conservative VMEM budget
    (safe for v7x's 64 MiB physical VMEM and v5e's small scoped default)."""
    hd = D // H

    def cands(n):
        return [n] + [t for t in (1024, 512, 384, 256, 128, 64, 32, 16, 8)
                      if t < n and n % t == 0]

    tq_list = [q_tile] if q_tile is not None else cands(L)
    tkv_list = [kv_tile] if kv_tile is not None else cands(M)
    for tq in tq_list:
        for tkv in tkv_list:
            if _vmem_estimate(tq, tkv, D, H, hd) <= budget_bytes:
                return tq, tkv
    return tq_list[-1], tkv_list[-1]


# --------------------------------------------------------------------------- #
# Kernel
# --------------------------------------------------------------------------- #
def _mha_kernel(*refs, n_heads: int, head_dim: int, q_tile: int, kv_tile: int,
                causal: bool):
    if causal:
        (q_ref, kh_ref, vh_ref,
         wq_ref, bq_ref, wp_ref, bp_ref,
         o_ref, qh_sc, m_sc, l_sc, acc_sc) = refs
        mask_ref = None
    else:
        (q_ref, kh_ref, vh_ref, mask_ref,
         wq_ref, bq_ref, wp_ref, bp_ref,
         o_ref, qh_sc, m_sc, l_sc, acc_sc) = refs

    H, hd, TQ, TKV = n_heads, head_dim, q_tile, kv_tile
    cdt = jnp.bfloat16

    lt = pl.program_id(1)
    kt = pl.program_id(2)
    kv_start = kt * TKV

    # --- once per query tile: project Q (scale folded into Wq/bq), cache it ---
    @pl.when(kt == 0)
    def _init():
        q = q_ref[0]                                                  # (TQ, D) bf16
        qp = jnp.dot(q, wq_ref[...],
                     preferred_element_type=jnp.float32) + bq_ref[0]  # (TQ, D) f32
        qh_sc[...] = pltpu.einshape("lhd->hld",
                                    qp.astype(cdt).reshape(TQ, H, hd))  # (H, TQ, hd)
        m_sc[...] = jnp.full(m_sc.shape, _NEG_INF, dtype=m_sc.dtype)
        l_sc[...] = jnp.zeros(l_sc.shape, dtype=l_sc.dtype)
        acc_sc[...] = jnp.zeros(acc_sc.shape, dtype=acc_sc.dtype)

    # --- one kv block: online (flash) softmax update ---------------------------
    def _attend():
        kh = kh_ref[0]                                                # (H, TKV, hd)
        vh = vh_ref[0]                                                # (H, TKV, hd)
        s = jnp.einsum("hld,hmd->hlm", qh_sc[...], kh,
                       preferred_element_type=jnp.float32)            # (H, TQ, TKV) f32

        if causal:
            # torch SDPA is_causal=True: top-left aligned lower-triangular mask.
            row = lt * TQ + jax.lax.broadcasted_iota(jnp.int32, (TQ, TKV), 0)
            col = kv_start + jax.lax.broadcasted_iota(jnp.int32, (TQ, TKV), 1)
            keep = (col <= row)[None, :, :]                           # (1, TQ, TKV)
        else:
            keep = (mask_ref[0, 0] > 0.0)[None, :, :]                 # (1, 1, TKV)

        s = jnp.where(keep, s, jnp.float32(_NEG_INF))

        m_prev = m_sc[...]
        m_new = jnp.maximum(m_prev, jnp.max(s, axis=-1, keepdims=True))
        alpha = jnp.exp(m_prev - m_new)
        p = jnp.exp(s - m_new)
        l_sc[...] = alpha * l_sc[...] + jnp.sum(p, axis=-1, keepdims=True)
        acc_sc[...] = alpha * acc_sc[...] + jnp.einsum(
            "hlm,hmd->hld", p.astype(cdt), vh,
            preferred_element_type=jnp.float32)
        m_sc[...] = m_new

    if causal:
        # Skip kv blocks that lie entirely above the diagonal for this q tile.
        pl.when(kv_start < (lt + 1) * TQ)(_attend)
    else:
        _attend()

    # --- finalize: normalize, merge heads, output projection -------------------
    @pl.when(kt == pl.num_programs(2) - 1)
    def _finalize():
        ctx = acc_sc[...] * pl.reciprocal(l_sc[...], approx=True)     # (H, TQ, hd)
        attn = pltpu.einshape("hld->lhd", ctx.astype(cdt)).reshape(TQ, H * hd)
        out = jnp.dot(attn, wp_ref[...],
                      preferred_element_type=jnp.float32) + bp_ref[0]
        o_ref[0] = out.astype(o_ref.dtype)


# --------------------------------------------------------------------------- #
# Wrapper
# --------------------------------------------------------------------------- #
def multi_head_attention(q_BLD, k_BMD, v_BMD, mask_B11M, params, n_heads,
                         q_tile=None, kv_tile=None, out_dtype=None):
    """Matches MultiHeadAttentionLayer.forward in eval mode (dropout_p = 0)."""
    B, L, D = q_BLD.shape
    M = k_BMD.shape[1]
    H = n_heads
    hd = D // H
    causal = mask_B11M is None
    out_dtype = out_dtype or q_BLD.dtype
    f32 = jnp.float32
    cdt = jnp.bfloat16

    TQ, TKV = _choose_tiles(L, M, D, H, q_tile=q_tile, kv_tile=kv_tile)
    assert L % TQ == 0 and (TQ == L or TQ % 8 == 0), "bad query tile"
    assert M % TKV == 0 and (TKV == M or TKV % 8 == 0), "bad kv tile"
    LT, KT = L // TQ, M // TKV

    scale = 1.0 / math.sqrt(hd)
    # nn.Linear stores W as (out, in); pre-transpose so the kernel does x @ W_t + b.
    # Fold the attention scale into the query projection (free, done once here).
    wq_t = (params["wq"].astype(f32).T * scale).astype(cdt)
    bq = (params["bq"].astype(f32) * scale).reshape(1, D)
    wp_t = params["wp"].astype(f32).T.astype(cdt)
    bp = params["bp"].astype(f32).reshape(1, D)

    # K/V projections + head relayout done ONCE here (one XLA matmul over (B*M,D))
    # so the Pallas kernel never recomputes them per query tile.
    kp = k_BMD.astype(f32) @ params["wk"].astype(f32).T + params["bk"].astype(f32)
    vp = v_BMD.astype(f32) @ params["wv"].astype(f32).T + params["bv"].astype(f32)
    kh = kp.reshape(B, M, H, hd).transpose(0, 2, 1, 3).astype(cdt)   # (B, H, M, hd)
    vh = vp.reshape(B, M, H, hd).transpose(0, 2, 1, 3).astype(cdt)   # (B, H, M, hd)

    q_in = q_BLD.astype(cdt)   # bf16 activations: half the DMA bytes

    kernel = functools.partial(_mha_kernel, n_heads=H, head_dim=hd,
                               q_tile=TQ, kv_tile=TKV, causal=causal)

    in_specs = [
        pl.BlockSpec((1, TQ, D), lambda b, lt, kt: (b, lt, 0)),         # q
        pl.BlockSpec((1, H, TKV, hd), lambda b, lt, kt: (b, 0, kt, 0)),  # Kh
        pl.BlockSpec((1, H, TKV, hd), lambda b, lt, kt: (b, 0, kt, 0)),  # Vh
    ]
    inputs = [q_in, kh, vh]
    if not causal:
        # Compact padding mask, pre-split per kv block: (B, KT, 1, TKV).
        mask_blk = mask_B11M.astype(f32).reshape(B, KT, 1, TKV)
        in_specs.append(pl.BlockSpec((1, 1, 1, TKV), lambda b, lt, kt: (b, kt, 0, 0)))
        inputs.append(mask_blk)

    w_spec = pl.BlockSpec((D, D), lambda b, lt, kt: (0, 0))
    b_spec = pl.BlockSpec((1, D), lambda b, lt, kt: (0, 0))
    in_specs += [w_spec, b_spec, w_spec, b_spec]
    inputs += [wq_t, bq, wp_t, bp]

    vmem_bytes = _vmem_estimate(TQ, TKV, D, H, hd)
    vmem_limit = int(min(max(vmem_bytes + (8 << 20), 32 << 20), 56 << 20))
    # TODO(synk): single-buffer the constant weight BlockSpecs (pl.Buffered(1))
    #             once buffer_count=1 is guaranteed supported, to shave VMEM on v7x.

    return pl.pallas_call(
        kernel,
        out_shape=jax.ShapeDtypeStruct((B, L, D), out_dtype),
        grid=(B, LT, KT),
        in_specs=in_specs,
        out_specs=pl.BlockSpec((1, TQ, D), lambda b, lt, kt: (b, lt, 0)),
        scratch_shapes=[
            pltpu.VMEM((H, TQ, hd), jnp.bfloat16),   # cached head-major Q
            pltpu.VMEM((H, TQ, 1), jnp.float32),     # running max
            pltpu.VMEM((H, TQ, 1), jnp.float32),     # running denom
            pltpu.VMEM((H, TQ, hd), jnp.float32),    # running context accumulator
        ],
        compiler_params=pltpu.CompilerParams(
            dimension_semantics=("parallel", "parallel", "arbitrary"),
            vmem_limit_bytes=vmem_limit),
    )(*inputs)


# --------------------------------------------------------------------------- #
# Pure-JAX reference (matches the PyTorch module in eval mode)
# --------------------------------------------------------------------------- #
def reference_mha(q, k, v, mask_B11M, params, n_heads):
    B, L, D = q.shape
    M = k.shape[1]
    hd = D // n_heads

    def lin(x, w, b):
        return x @ w.T + b

    Q = lin(q, params["wq"], params["bq"]).reshape(B, L, n_heads, hd).transpose(0, 2, 1, 3)
    K = lin(k, params["wk"], params["bk"]).reshape(B, M, n_heads, hd).transpose(0, 2, 1, 3)
    V = lin(v, params["wv"], params["bv"]).reshape(B, M, n_heads, hd).transpose(0, 2, 1, 3)

    scores = jnp.einsum("bhld,bhmd->bhlm", Q, K) / math.sqrt(hd)
    if mask_B11M is None:
        causal = jnp.tril(jnp.ones((L, M), bool))[None, None]
        scores = jnp.where(causal, scores, _NEG_INF)
    else:
        scores = jnp.where(mask_B11M.astype(bool), scores, _NEG_INF)
    probs = jax.nn.softmax(scores, axis=-1)
    out = jnp.einsum("bhlm,bhmd->bhld", probs, V)
    out = out.transpose(0, 2, 1, 3).reshape(B, L, D)
    return lin(out, params["wp"], params["bp"])


def _make_params(key, D):
    keys = jax.random.split(key, 8)
    s = 1.0 / math.sqrt(D)
    names = ["wq", "bq", "wk", "bk", "wv", "bv", "wp", "bp"]
    shapes = [(D, D), (D,), (D, D), (D,), (D, D), (D,), (D, D), (D,)]
    return {n: jax.random.uniform(kk, sh, jnp.float32, -s, s)
            for n, kk, sh in zip(names, keys, shapes)}


def _run_case(key, B, L, M, D, H, q_tile=None, kv_tile=None, atol=5e-2, rtol=5e-2):
    keys = jax.random.split(key, 4)
    params = _make_params(keys[0], D)
    q = jax.random.normal(keys[1], (B, L, D), jnp.float32)
    k = jax.random.normal(keys[2], (B, M, D), jnp.float32)
    v = jax.random.normal(keys[3], (B, M, D), jnp.float32)

    # padding-style mask (B, 1, 1, M): batch 1 masks its last 2 memory positions
    mask_B11M = jnp.ones((B, 1, 1, M), jnp.float32)
    mask_B11M = mask_B11M.at[1, 0, 0, M - 2:].set(0.0)

    out = jax.block_until_ready(
        multi_head_attention(q, k, v, mask_B11M, params, H,
                             q_tile=q_tile, kv_tile=kv_tile))
    ref = reference_mha(q, k, v, mask_B11M, params, H)
    assert out.shape == (B, L, D)
    assert not bool(jnp.any(jnp.isnan(out))), "NaN in masked-path output"
    assert jnp.allclose(out, ref, atol=atol, rtol=rtol), "masked path mismatch"

    out_c = jax.block_until_ready(
        multi_head_attention(q, k, v, None, params, H,
                             q_tile=q_tile, kv_tile=kv_tile))
    ref_c = reference_mha(q, k, v, None, params, H)
    assert not bool(jnp.any(jnp.isnan(out_c))), "NaN in causal-path output"
    assert jnp.allclose(out_c, ref_c, atol=atol, rtol=rtol), "causal path mismatch"


if __name__ == "__main__":
    root = jax.random.PRNGKey(0)
    k1, k2 = jax.random.split(root)

    # Case 1: single q tile, single kv block per batch element (grid = (B, 1, 1)).
    _run_case(k1, B=2, L=8, M=8, D=32, H=4)

    # Case 2: exercise flash accumulation, causal kv-block skip and padding mask
    # across kv blocks (grid = (B, 2, 2)).
    _run_case(k2, B=2, L=16, M=16, D=32, H=4, q_tile=8, kv_tile=8)

    print("KERNEL_OK")
</pallas_src>

<mosaic_0001>
module attributes {stable_mosaic.version = 11 : i64} {
  func.func @_mha_kernel(%arg0: i32, %arg1: i32, %arg2: i32, %arg3: memref<1x8x32xbf16, #tpu.memory_space<vmem>>, %arg4: memref<1x4x8x8xbf16, #tpu.memory_space<vmem>>, %arg5: memref<1x4x8x8xbf16, #tpu.memory_space<vmem>>, %arg6: memref<1x1x1x8xf32, #tpu.memory_space<vmem>>, %arg7: memref<32x32xbf16, #tpu.memory_space<vmem>>, %arg8: memref<1x32xf32, #tpu.memory_space<vmem>>, %arg9: memref<32x32xbf16, #tpu.memory_space<vmem>>, %arg10: memref<1x32xf32, #tpu.memory_space<vmem>>, %arg11: memref<1x8x32xf32, #tpu.memory_space<vmem>>, %arg12: memref<4x8x8xbf16, #tpu.memory_space<vmem>>, %arg13: memref<4x8x1xf32, #tpu.memory_space<vmem>>, %arg14: memref<4x8x1xf32, #tpu.memory_space<vmem>>, %arg15: memref<4x8x8xf32, #tpu.memory_space<vmem>>) attributes {dimension_semantics = [#tpu.dimension_semantics<parallel>, #tpu.dimension_semantics<parallel>, #tpu.dimension_semantics<arbitrary>], iteration_bounds = array<i64: 2, 1, 1>, scalar_prefetch = 0 : i64, scratch_operands = 4 : i64, tpu.core_type = #tpu.core_type<tc>, window_params = [{transform_indices = @transform_0, window_bounds = array<i64: 1, 8, 32>}, {transform_indices = @transform_1, window_bounds = array<i64: 1, 4, 8, 8>}, {transform_indices = @transform_2, window_bounds = array<i64: 1, 4, 8, 8>}, {transform_indices = @transform_3, window_bounds = array<i64: 1, 1, 1, 8>}, {pipeline_mode = #tpu.pipeline_mode<synchronous>, transform_indices = @transform_4, window_bounds = array<i64: 32, 32>}, {pipeline_mode = #tpu.pipeline_mode<synchronous>, transform_indices = @transform_5, window_bounds = array<i64: 1, 32>}, {pipeline_mode = #tpu.pipeline_mode<synchronous>, transform_indices = @transform_6, window_bounds = array<i64: 32, 32>}, {pipeline_mode = #tpu.pipeline_mode<synchronous>, transform_indices = @transform_7, window_bounds = array<i64: 1, 32>}, {transform_indices = @transform_8, window_bounds = array<i64: 1, 8, 32>}]} {
    %c0_i32 = arith.constant 0 : i32
    %0 = arith.cmpi eq, %arg2, %c0_i32 : i32
    %1 = arith.extui %0 : i1 to i32
    %c0_i32_0 = arith.constant 0 : i32
    %2 = arith.cmpi ne, %1, %c0_i32_0 : i32
    scf.if %2 {
      %c0_40 = arith.constant 0 : index
      %c0_41 = arith.constant 0 : index
      %c0_42 = arith.constant 0 : index
      %44 = vector.load %arg3[%c0_40, %c0_41, %c0_42] : memref<1x8x32xbf16, #tpu.memory_space<vmem>>, vector<1x8x32xbf16>
      %45 = vector.shape_cast %44 : vector<1x8x32xbf16> to vector<8x32xbf16>
      %c0_43 = arith.constant 0 : index
      %c0_44 = arith.constant 0 : index
      %46 = vector.load %arg7[%c0_43, %c0_44] : memref<32x32xbf16, #tpu.memory_space<vmem>>, vector<32x32xbf16>
      %cst_45 = arith.constant dense<0.000000e+00> : vector<8x32xf32>
      %47 = tpu.matmul %45, %46, %cst_45 {dimension_numbers = #tpu.dot_dimension_numbers<[1], [0], [0], [1], [0, 0, 1, 1], [], []>} : vector<8x32xbf16>, vector<32x32xbf16>, vector<8x32xf32> -> vector<8x32xf32>
      %c0_46 = arith.constant 0 : index
      %c0_47 = arith.constant 0 : index
      %48 = vector.load %arg8[%c0_46, %c0_47] : memref<1x32xf32, #tpu.memory_space<vmem>>, vector<1x32xf32>
      %49 = vector.shape_cast %48 : vector<1x32xf32> to vector<32xf32>
      %50 = vector.shape_cast %49 : vector<32xf32> to vector<1x32xf32>
      %51 = vector.broadcast %50 : vector<1x32xf32> to vector<8x32xf32>
      %52 = arith.addf %47, %51 : vector<8x32xf32>
      %53 = arith.truncf %52 : vector<8x32xf32> to vector<8x32xbf16>
      %54 = vector.shape_cast %53 : vector<8x32xbf16> to vector<8x4x8xbf16>
      %55 = tpu.transpose %54, [1, 0, 2] : vector<8x4x8xbf16> -> vector<4x8x8xbf16>
      %c0_48 = arith.constant 0 : index
      %c0_49 = arith.constant 0 : index
      %c0_50 = arith.constant 0 : index
      %56 = vector.load %arg12[%c0_48, %c0_49, %c0_50] : memref<4x8x8xbf16, #tpu.memory_space<vmem>>, vector<4x8x8xbf16>
      tpu.vector_store %arg12[%c0_48, %c0_49, %c0_50], %55 {strides = array<i32>} : memref<4x8x8xbf16, #tpu.memory_space<vmem>>, vector<4x8x8xbf16>,
      %cst_51 = arith.constant -1.000000e+30 : f32
      %57 = vector.broadcast %cst_51 : f32 to vector<4x8x1xf32>
      %c0_52 = arith.constant 0 : index
      %c0_53 = arith.constant 0 : index
      %c0_54 = arith.constant 0 : index
      %58 = vector.load %arg13[%c0_52, %c0_53, %c0_54] : memref<4x8x1xf32, #tpu.memory_space<vmem>>, vector<4x8x1xf32>
      tpu.vector_store %arg13[%c0_52, %c0_53, %c0_54], %57 {strides = array<i32>} : memref<4x8x1xf32, #tpu.memory_space<vmem>>, vector<4x8x1xf32>,
      %cst_55 = arith.constant 0.000000e+00 : f32
      %59 = vector.broadcast %cst_55 : f32 to vector<4x8x1xf32>
      %c0_56 = arith.constant 0 : index
      %c0_57 = arith.constant 0 : index
      %c0_58 = arith.constant 0 : index
      %60 = vector.load %arg14[%c0_56, %c0_57, %c0_58] : memref<4x8x1xf32, #tpu.memory_space<vmem>>, vector<4x8x1xf32>
      tpu.vector_store %arg14[%c0_56, %c0_57, %c0_58], %59 {strides = array<i32>} : memref<4x8x1xf32, #tpu.memory_space<vmem>>, vector<4x8x1xf32>,
      %cst_59 = arith.constant 0.000000e+00 : f32
      %61 = vector.broadcast %cst_59 : f32 to vector<4x8x8xf32>
      %c0_60 = arith.constant 0 : index
      %c0_61 = arith.constant 0 : index
      %c0_62 = arith.constant 0 : index
      %62 = vector.load %arg15[%c0_60, %c0_61, %c0_62] : memref<4x8x8xf32, #tpu.memory_space<vmem>>, vector<4x8x8xf32>
      tpu.vector_store %arg15[%c0_60, %c0_61, %c0_62], %61 {strides = array<i32>} : memref<4x8x8xf32, #tpu.memory_space<vmem>>, vector<4x8x8xf32>,
    } else {
    }
    %c0 = arith.constant 0 : index
    %c0_1 = arith.constant 0 : index
    %c0_2 = arith.constant 0 : index
    %c0_3 = arith.constant 0 : index
    %3 = vector.load %arg4[%c0, %c0_1, %c0_2, %c0_3] : memref<1x4x8x8xbf16, #tpu.memory_space<vmem>>, vector<1x4x8x8xbf16>
    %4 = vector.shape_cast %3 : vector<1x4x8x8xbf16> to vector<4x8x8xbf16>
    %c0_4 = arith.constant 0 : index
    %c0_5 = arith.constant 0 : index
    %c0_6 = arith.constant 0 : index
    %c0_7 = arith.constant 0 : index
    %5 = vector.load %arg5[%c0_4, %c0_5, %c0_6, %c0_7] : memref<1x4x8x8xbf16, #tpu.memory_space<vmem>>, vector<1x4x8x8xbf16>
    %6 = vector.shape_cast %5 : vector<1x4x8x8xbf16> to vector<4x8x8xbf16>
    %c0_8 = arith.constant 0 : index
    %c0_9 = arith.constant 0 : index
    %c0_10 = arith.constant 0 : index
    %7 = vector.load %arg12[%c0_8, %c0_9, %c0_10] : memref<4x8x8xbf16, #tpu.memory_space<vmem>>, vector<4x8x8xbf16>
    "tpu.trace_start"() <{level = 10 : i32, message = "hld,hmd->hlm"}> : () -> ()
    %cst = arith.constant dense<0.000000e+00> : vector<4x8x8xf32>
    %8 = tpu.matmul %7, %4, %cst {dimension_numbers = #tpu.dot_dimension_numbers<[2], [2], [1], [1], [0, 0, 0, 1, 1, 1], [0], [0]>} : vector<4x8x8xbf16>, vector<4x8x8xbf16>, vector<4x8x8xf32> -> vector<4x8x8xf32>
    "tpu.trace_stop"() : () -> ()
    %c0_11 = arith.constant 0 : index
    %c0_12 = arith.constant 0 : index
    %c0_13 = arith.constant 0 : index
    %c0_14 = arith.constant 0 : index
    %9 = vector.load %arg6[%c0_11, %c0_12, %c0_13, %c0_14] : memref<1x1x1x8xf32, #tpu.memory_space<vmem>>, vector<1x1x1x8xf32>
    %10 = vector.shape_cast %9 : vector<1x1x1x8xf32> to vector<1x8xf32>
    %cst_15 = arith.constant 0.000000e+00 : f32
    %11 = vector.broadcast %cst_15 : f32 to vector<1x8xf32>
    %12 = arith.cmpf ogt, %10, %11 : vector<1x8xf32>
    %13 = vector.shape_cast %12 : vector<1x8xi1> to vector<1x1x8xi1>
    %cst_16 = arith.constant -1.000000e+30 : f32
    %14 = vector.shape_cast %13 : vector<1x1x8xi1> to vector<1x1x8xi1>
    %15 = vector.broadcast %14 : vector<1x1x8xi1> to vector<4x8x8xi1>
    %16 = vector.broadcast %cst_16 : f32 to vector<4x8x8xf32>
    %17 = arith.select %15, %8, %16 : vector<4x8x8xi1>, vector<4x8x8xf32>
    %c0_17 = arith.constant 0 : index
    %c0_18 = arith.constant 0 : index
    %c0_19 = arith.constant 0 : index
    %18 = vector.load %arg13[%c0_17, %c0_18, %c0_19] : memref<4x8x1xf32, #tpu.memory_space<vmem>>, vector<4x8x1xf32>
    %cst_20 = arith.constant dense<0xFF800000> : vector<4x8xf32>
    %19 = vector.multi_reduction <maximumf>, %17, %cst_20 [2] : vector<4x8x8xf32> to vector<4x8xf32>
    %20 = vector.shape_cast %19 : vector<4x8xf32> to vector<4x8x1xf32>
    %21 = arith.maximumf %18, %20 : vector<4x8x1xf32>
    %22 = arith.subf %18, %21 : vector<4x8x1xf32>
    %23 = math.exp %22 : vector<4x8x1xf32>
    %24 = vector.broadcast %21 : vector<4x8x1xf32> to vector<4x8x8xf32>
    %25 = arith.subf %17, %24 : vector<4x8x8xf32>
    %26 = math.exp %25 : vector<4x8x8xf32>
    %c0_21 = arith.constant 0 : index
    %c0_22 = arith.constant 0 : index
    %c0_23 = arith.constant 0 : index
    %27 = vector.load %arg14[%c0_21, %c0_22, %c0_23] : memref<4x8x1xf32, #tpu.memory_space<vmem>>, vector<4x8x1xf32>
    %28 = arith.mulf %23, %27 : vector<4x8x1xf32>
    %cst_24 = arith.constant dense<0.000000e+00> : vector<4x8xf32>
    %29 = vector.multi_reduction <add>, %26, %cst_24 [2] : vector<4x8x8xf32> to vector<4x8xf32>
    %30 = vector.shape_cast %29 : vector<4x8xf32> to vector<4x8x1xf32>
    %31 = arith.addf %28, %30 : vector<4x8x1xf32>
    %c0_25 = arith.constant 0 : index
    %c0_26 = arith.constant 0 : index
    %c0_27 = arith.constant 0 : index
    %32 = vector.load %arg14[%c0_25, %c0_26, %c0_27] : memref<4x8x1xf32, #tpu.memory_space<vmem>>, vector<4x8x1xf32>
    tpu.vector_store %arg14[%c0_25, %c0_26, %c0_27], %31 {strides = array<i32>} : memref<4x8x1xf32, #tpu.memory_space<vmem>>, vector<4x8x1xf32>,
    %c0_28 = arith.constant 0 : index
    %c0_29 = arith.constant 0 : index
    %c0_30 = arith.constant 0 : index
    %33 = vector.load %arg15[%c0_28, %c0_29, %c0_30] : memref<4x8x8xf32, #tpu.memory_space<vmem>>, vector<4x8x8xf32>
    %34 = vector.broadcast %23 : vector<4x8x1xf32> to vector<4x8x8xf32>
    %35 = arith.mulf %34, %33 : vector<4x8x8xf32>
    %36 = arith.truncf %26 : vector<4x8x8xf32> to vector<4x8x8xbf16>
    "tpu.trace_start"() <{level = 10 : i32, message = "hlm,hmd->hld"}> : () -> ()
    %cst_31 = arith.constant dense<0.000000e+00> : vector<4x8x8xf32>
    %37 = tpu.matmul %36, %6, %cst_31 {dimension_numbers = #tpu.dot_dimension_numbers<[2], [1], [1], [2], [0, 0, 0, 1, 1, 2], [0], [0]>} : vector<4x8x8xbf16>, vector<4x8x8xbf16>, vector<4x8x8xf32> -> vector<4x8x8xf32>
    "tpu.trace_stop"() : () -> ()
    %38 = arith.addf %35, %37 : vector<4x8x8xf32>
    %c0_32 = arith.constant 0 : index
    %c0_33 = arith.constant 0 : index
    %c0_34 = arith.constant 0 : index
    %39 = vector.load %arg15[%c0_32, %c0_33, %c0_34] : memref<4x8x8xf32, #tpu.memory_space<vmem>>, vector<4x8x8xf32>
    tpu.vector_store %arg15[%c0_32, %c0_33, %c0_34], %38 {strides = array<i32>} : memref<4x8x8xf32, #tpu.memory_space<vmem>>, vector<4x8x8xf32>,
    %c0_35 = arith.constant 0 : index
    %c0_36 = arith.constant 0 : index
    %c0_37 = arith.constant 0 : index
    %40 = vector.load %arg13[%c0_35, %c0_36, %c0_37] : memref<4x8x1xf32, #tpu.memory_space<vmem>>, vector<4x8x1xf32>
    tpu.vector_store %arg13[%c0_35, %c0_36, %c0_37], %21 {strides = array<i32>} : memref<4x8x1xf32, #tpu.memory_space<vmem>>, vector<4x8x1xf32>,
    %c0_i32_38 = arith.constant 0 : i32
    %41 = arith.cmpi eq, %arg2, %c0_i32_38 : i32
    %42 = arith.extui %41 : i1 to i32
    %c0_i32_39 = arith.constant 0 : i32
    %43 = arith.cmpi ne, %42, %c0_i32_39 : i32
    scf.if %43 {
      %c0_40 = arith.constant 0 : index
      %c0_41 = arith.constant 0 : index
      %c0_42 = arith.constant 0 : index
      %44 = vector.load %arg15[%c0_40, %c0_41, %c0_42] : memref<4x8x8xf32, #tpu.memory_space<vmem>>, vector<4x8x8xf32>
      %c0_43 = arith.constant 0 : index
      %c0_44 = arith.constant 0 : index
      %c0_45 = arith.constant 0 : index
      %45 = vector.load %arg14[%c0_43, %c0_44, %c0_45] : memref<4x8x1xf32, #tpu.memory_space<vmem>>, vector<4x8x1xf32>
      %46 = tpu.reciprocal %45 {approx = true} : vector<4x8x1xf32> -> vector<4x8x1xf32>
      %47 = vector.broadcast %46 : vector<4x8x1xf32> to vector<4x8x8xf32>
      %48 = arith.mulf %44, %47 : vector<4x8x8xf32>
      %49 = arith.truncf %48 : vector<4x8x8xf32> to vector<4x8x8xbf16>
      %50 = tpu.transpose %49, [1, 0, 2] : vector<4x8x8xbf16> -> vector<8x4x8xbf16>
      %51 = vector.shape_cast %50 : vector<8x4x8xbf16> to vector<8x32xbf16>
      %c0_46 = arith.constant 0 : index
      %c0_47 = arith.constant 0 : index
      %52 = vector.load %arg9[%c0_46, %c0_47] : memref<32x32xbf16, #tpu.memory_space<vmem>>, vector<32x32xbf16>
      %cst_48 = arith.constant dense<0.000000e+00> : vector<8x32xf32>
      %53 = tpu.matmul %51, %52, %cst_48 {dimension_numbers = #tpu.dot_dimension_numbers<[1], [0], [0], [1], [0, 0, 1, 1], [], []>} : vector<8x32xbf16>, vector<32x32xbf16>, vector<8x32xf32> -> vector<8x32xf32>
      %c0_49 = arith.constant 0 : index
      %c0_50 = arith.constant 0 : index
      %54 = vector.load %arg10[%c0_49, %c0_50] : memref<1x32xf32, #tpu.memory_space<vmem>>, vector<1x32xf32>
      %55 = vector.shape_cast %54 : vector<1x32xf32> to vector<32xf32>
      %56 = vector.shape_cast %55 : vector<32xf32> to vector<1x32xf32>
      %57 = vector.broadcast %56 : vector<1x32xf32> to vector<8x32xf32>
      %58 = arith.addf %53, %57 : vector<8x32xf32>
      %c0_51 = arith.constant 0 : index
      %c0_52 = arith.constant 0 : index
      %c0_53 = arith.constant 0 : index
      %59 = vector.load %arg11[%c0_51, %c0_52, %c0_53] : memref<1x8x32xf32, #tpu.memory_space<vmem>>, vector<1x8x32xf32>
      %60 = vector.shape_cast %59 : vector<1x8x32xf32> to vector<8x32xf32>
      %61 = vector.shape_cast %58 : vector<8x32xf32> to vector<1x8x32xf32>
      tpu.vector_store %arg11[%c0_51, %c0_52, %c0_53], %61 {strides = array<i32>} : memref<1x8x32xf32, #tpu.memory_space<vmem>>, vector<1x8x32xf32>,
    } else {
    }
    return
  }
  func.func @transform_0(%arg0: i32, %arg1: i32, %arg2: i32) -> (i32, i32, i32) {
    %c0_i32 = arith.constant 0 : i32
    %c0_i32_0 = arith.constant 0 : i32
    return %arg0, %arg1, %c0_i32 : i32, i32, i32
  }
  func.func @transform_1(%arg0: i32, %arg1: i32, %arg2: i32) -> (i32, i32, i32, i32) {
    %c0_i32 = arith.constant 0 : i32
    %c0_i32_0 = arith.constant 0 : i32
    %c0_i32_1 = arith.constant 0 : i32
    return %arg0, %c0_i32, %arg2, %c0_i32_0 : i32, i32, i32, i32
  }
  func.func @transform_2(%arg0: i32, %arg1: i32, %arg2: i32) -> (i32, i32, i32, i32) {
    %c0_i32 = arith.constant 0 : i32
    %c0_i32_0 = arith.constant 0 : i32
    %c0_i32_1 = arith.constant 0 : i32
    return %arg0, %c0_i32, %arg2, %c0_i32_0 : i32, i32, i32, i32
  }
  func.func @transform_3(%arg0: i32, %arg1: i32, %arg2: i32) -> (i32, i32, i32, i32) {
    %c0_i32 = arith.constant 0 : i32
    %c0_i32_0 = arith.constant 0 : i32
    %c0_i32_1 = arith.constant 0 : i32
    return %arg0, %arg2, %c0_i32, %c0_i32_0 : i32, i32, i32, i32
  }
  func.func @transform_4(%arg0: i32, %arg1: i32, %arg2: i32) -> (i32, i32) {
    %c0_i32 = arith.constant 0 : i32
    %c0_i32_0 = arith.constant 0 : i32
    %c0_i32_1 = arith.constant 0 : i32
    return %c0_i32, %c0_i32_0 : i32, i32
  }
  func.func @transform_5(%arg0: i32, %arg1: i32, %arg2: i32) -> (i32, i32) {
    %c0_i32 = arith.constant 0 : i32
    %c0_i32_0 = arith.constant 0 : i32
    %c0_i32_1 = arith.constant 0 : i32
    return %c0_i32, %c0_i32_0 : i32, i32
  }
  func.func @transform_6(%arg0: i32, %arg1: i32, %arg2: i32) -> (i32, i32) {
    %c0_i32 = arith.constant 0 : i32
    %c0_i32_0 = arith.constant 0 : i32
    %c0_i32_1 = arith.constant 0 : i32
    return %c0_i32, %c0_i32_0 : i32, i32
  }
  func.func @transform_7(%arg0: i32, %arg1: i32, %arg2: i32) -> (i32, i32) {
    %c0_i32 = arith.constant 0 : i32
    %c0_i32_0 = arith.constant 0 : i32
    %c0_i32_1 = arith.constant 0 : i32
    return %c0_i32, %c0_i32_0 : i32, i32
  }
  func.func @transform_8(%arg0: i32, %arg1: i32, %arg2: i32) -> (i32, i32, i32) {
    %c0_i32 = arith.constant 0 : i32
    %c0_i32_0 = arith.constant 0 : i32
    return %arg0, %arg1, %c0_i32 : i32, i32, i32
  }
}

</mosaic_0001>

<bundles_post_ra>
// kernel: tpu_custom_call.1
= control target key start
LH: loop header
LB: loop body
LE: loop exit
PB: predicated region body
PF: predicated region fallthrough
CT: control target
= control target key end

     0   :  { %s2761_s0 = inlined_call_operand.hbm [shape: bf16[2,8,32], index: 0, kind: input, shape index: {}]   ;;  %s2762_s1 = inlined_call_operand.hbm [shape: bf16[2,4,8,8], index: 1, kind: input, shape index: {}]   ;;  %s2763_s2 = inlined_call_operand.hbm [shape: bf16[2,4,8,8], index: 2, kind: input, shape index: {}]   ;;  %s2764_s3 = inlined_call_operand.vmem [shape: f32[2,1,1,8], index: 3, kind: input, shape index: {}]   ;;  %s2765_s4 = inlined_call_operand.hbm [shape: bf16[32,32], index: 4, kind: input, shape index: {}]   ;;  %s2766_s5 = inlined_call_operand.vmem [shape: f32[1,32], index: 5, kind: input, shape index: {}]   ;;  %s2767_s6 = inlined_call_operand.hbm [shape: bf16[32,32], index: 6, kind: input, shape index: {}]   ;;  %s2768_s7 = inlined_call_operand.vmem [shape: f32[1,32], index: 7, kind: input, shape index: {}]   ;;  %s2769_s8 = inlined_call_operand.hbm [shape: f32[2,8,32], index: 8, kind: output, shape index: {}]  }
   0x1   :  { %2781 = sst [smem:[#allocation25_spill]] %s2762_s1 }
   0x2   :  { %2782 = sst [smem:[#allocation26_spill]] %s2763_s2 }
   0x3   :  { %2783 = sst [smem:[#allocation27_spill]] %s2765_s4 }
   0x4   :  { %2784 = sst [smem:[#allocation28_spill]] %s2768_s7 }
   0x5   :  { %2785 = sst [smem:[#allocation29_spill]] %s2769_s8 }
   0x6   :  { %13 = vsyncpa [#allocation7], 0 }
   0x7   :  { %15 = vsyncpa [#allocation7 + $0x1], 0 }
   0x8   :  { %16 = vsyncpa [#allocation10], 0 }
   0x9   :  { %18 = vsyncpa [#allocation10 + $0x1], 0 }
   0xa   :  { %19 = vsyncpa [#allocation13], 0 }
   0xb   :  { %20 = vsyncpa [#allocation8], 0 }
   0xc   :  { %22 = vsyncpa [#allocation8 + $0x1], 0  ;;  %s2294_s27 = smov 0   ;;  %s2296_s28 = smov 0  }
   0xd   :  { %s2298_s29 = smov 0   ;;  %s2300_s30 = smov 0  }
   0xe   :  { %s2302_s9 = smov 0   ;;  %s2304_s10 = smov 0  }
   0xf LB: > { %2786 = sst [smem:[#allocation20_spill]] %s2207_s27  ;;  %s2325_s11 = sadd.s32 4294967295, %s2227_s10   ;;  %s2227_s10 = sphi %s2304_s10, %s28_s10   ;;  %s2223_s9 = sphi %s2302_s9, %s2821_s9   ;;  %s2219_s30 = sphi %s2300_s30, %s2820_s30   ;;  %s2215_s29 = sphi %s2298_s29, %s2819_s29   ;;  %s2211_s28 = sphi %s2296_s28, %s2818_s28   ;;  %s2207_s27 = sphi %s2294_s27, %s2817_s27  }
  0x10   : > { %s1738_s12 = sadd.s32 4294967294, %s2227_s10   ;;  %p63_p0 = scmp.ne.s32.totalorder %s2215_s29, %s2211_s28 }
  0x11   : > { %p64_p1 = scmp.eq.s32.totalorder %s2227_s10, 0  ;;  %p69_p2 = scmp.ne.s32.totalorder %s2211_s28, %s2207_s27 }
  0x12   : > { %p2770_p3 = scmp.eq.s32.totalorder %s2325_s11, 0  ;;  %p263_p4 = scmp.eq.s32.totalorder %s2325_s11, 1 }
  0x13   : > { %p2336_p5 = por %p64_p1, %p63_p0  ;;  %p269_p6 = scmp.eq.s32.totalorder %s1738_s12, 1 }
  0x14   : > { %p2342_p7 = por %p2770_p3, %p69_p2  ;;  %p2346_p8 = por %p263_p4, %p63_p0 }
  0x15   : > { %p2350_p9 = por %p269_p6, %p69_p2  ;;  %p1739_p10 = scmp.ge.s32.totalorder %s2227_s10, 1 }
  0x16   : > { %s2789_s16 = scalar_select %p2346_p8, 1, 0 }
  0x17   : > { %s2791_s17 = scalar_select %p2350_p9, 1, 0 }
  0x18   : > { %2790 = sst [smem:[#allocation21_spill]] %s2789_s16  ;;  %p276_p11 = scmp.lt.s32.totalorder %s2227_s10, 3 }
  0x19   : > { %2792 = sst [smem:[#allocation22_spill]] %s2791_s17  ;;  %s2229_s19 = smov [#allocation12]  }
  0x1a   : > { %p2356_p12 = pnand %p1739_p10, %p276_p11  ;;  %s288_s20 = sshll.u32 %s2229_s19, 4  ;;  %s289_s20 = int_to_ptr.vmem [resolvable:$true] %s288_s20 }
  0x1b   : > { %s47_s22 = sadd.s32 1, %s2223_s9  ;;  %s2372_s23 = sand.u32 1, %s2215_s29  }
  0x1c   : > { %p1882_p13 = pneg %p2356_p12  ;;  %p2374_p2 = scmp.ge.s32.totalorder %s47_s22, 2 }
  0x1d   : > { %s2014_s25 = scalar_lea.vmem %s289_s20, 256  ;;  %p2022_p0 = scmp.lt.s32.totalorder %s289_s20, %s289_s20 }
  0x1e   : > { %p2366_p4 = pnand %p1882_p13, %p2770_p3  ;;  %p2015_p10 = scmp.ne.s32.totalorder %s289_s20, %s2014_s25 }
  0x1f   : > { %p2023_p3 = scmp.lt.s32.totalorder %s2014_s25, %s2014_s25 }
  0x20   : > { %p2005_p6 = pneg %p2366_p4 }
  0x21   : > { %p2024_p1 = por %p2023_p3, %p2022_p0 }
  0x22   : > { %p2017_p11 = pnand %p2015_p10, %p2005_p6 }
  0x24   : > { %p2018_p13 = pneg %p2017_p11 }
  0x26   : > { %p2025_p9 = pnand %p2024_p1, %p2018_p13 }
  0x28   : > { %2028 = shalt.err (!%p2025_p9)
}
  0x29   : > { %s2776_s26 = smov 64   ;;  %s2778_s12 = smov 4  }
  0x2a   : > { %s2796_s4 = sld [smem:[#allocation27_spill]]  ;;  %s2823_s22 = smov (%p2374_p2, %s47_s22), 0 }
  0x2b   : > { %2797 = sst [smem:[#allocation23_spill]] %s2823_s22  ;;  %p2798_p3 = scmp.lt.s32.totalorder %s2227_s10, 2 }
  0x2c   : > { %s340_s17 = sand.u32 1, %s2227_s10   ;;  %s51_s27 = ssub.s32 %s2223_s9, %s2823_s22 }
  0x2d   : > { %p2399_p9 = pnand %p2798_p3, %p2336_p5  ;;  %p54_p0 = scmp.eq.s32.totalorder %s51_s27, 0 }
  0x2e   : > { %s1745_s8 = sshll.u32 %s2372_s23, 4  ;;  %s1778_s7 = sshll.u32 %s2223_s9, 8 }
  0x2f   : > { %s2800_s16 = sadd.s32 1, %s2215_s29  ;;  %s2802_s1 = sld [smem:[#allocation25_spill]] }
  0x30   : > { %1885 = dma.hbm_to_vmem [thread:$0]  (!%p2366_p4), %s2796_s4, 256, %s289_s20, [#allocation13], %s2776_s26, %s2776_s26, %s2778_s12  }
  0x31   : > { %s2411_s19 = scalar_select %p54_p0, %s2215_s29, %s2800_s16  }
  0x32   : > { %s344_s25 = scalar_lea.vmem [#allocation9], %s1745_s8  ;;  %s2416_s12 = scalar_lea.sflag [#allocation10], %s340_s17 }
  0x33   : > { %2801 = sst [smem:[#allocation24_spill]] %s2411_s19  ;;  %s352_s26 = sshll.u32 %s344_s25, 4  ;;  %s353_s26 = int_to_ptr.vmem [resolvable:$true] %s352_s26 }
  0x34   : > { %p2031_p5 = pneg %p2399_p9  ;;  %s2042_s4 = scalar_lea.vmem %s353_s26, 256 }
  0x35   : > { %s351_s14 = scalar_lea.hbm %s2802_s1, %s1778_s7  ;;  %p2043_p1 = scmp.ne.s32.totalorder %s353_s26, %s2042_s4 }
  0x36   : > { %s2232_s27 = smov [#allocation9]  }
  0x37   : > { %p2045_p2 = pnand %p2043_p1, %p2031_p5  ;;  %s2047_s16 = sshll.u32 %s2232_s27, 4  ;;  %s2048_s16 = int_to_ptr.vmem [resolvable:$false] %s2047_s16 }
  0x38   : > { %s2049_s22 = scalar_lea.vmem %s2048_s16, 512  ;;  %p2050_p11 = scmp.lt.s32.totalorder %s353_s26, %s2048_s16 }
  0x39   : > { %p2046_p10 = pneg %p2045_p2  ;;  %p2051_p13 = scmp.lt.s32.totalorder %s2049_s22, %s2042_s4 }
  0x3b   : > { %p2052_p3 = por %p2051_p13, %p2050_p11 }
  0x3d   : > { %p2053_p0 = pnand %p2052_p3, %p2046_p10 }
  0x3f   : > { %2056 = shalt.err (!%p2053_p0)
}
  0x40   : > { %s2803_s17 = smov 4   ;;  %s2804_s20 = smov 64  }
  0x41   : > { %1895 = dma.hbm_to_vmem [thread:$0]  (!%p2399_p9), %s351_s14, 256, %s353_s26, %s2416_s12, %s2804_s20, %s2804_s20, %s2803_s17  }
  0x42   : > { %s2805_s2 = sld [smem:[#allocation26_spill]]  ;;  %s366_s27 = scalar_lea.vmem [#allocation11], %s1745_s8 }
  0x43   : > { %s374_s19 = sshll.u32 %s366_s27, 4  ;;  %s2233_s16 = smov [#allocation14]   ;;  %s2450_s19 = int_to_ptr.vmem [resolvable:$true] %s374_s19 }
  0x44   : > { %s304_s4 = sshll.u32 %s2233_s16, 4  ;;  %s305_s4 = int_to_ptr.vmem [resolvable:$true] %s304_s4 }
  0x45   : > { %s2068_s22 = scalar_lea.vmem %s305_s4, 256  ;;  %p2076_p11 = scmp.lt.s32.totalorder %s305_s4, %s305_s4 }
  0x46   : > { %p2069_p1 = scmp.ne.s32.totalorder %s305_s4, %s2068_s22  ;;  %p2077_p13 = scmp.lt.s32.totalorder %s2068_s22, %s2068_s22 }
  0x48   : > { %s2432_s1 = scalar_lea.hbm %s2805_s2, %s1778_s7  ;;  %p2071_p2 = pnand %p2069_p1, %p2005_p6 }
  0x49   : > { %p2078_p3 = por %p2077_p13, %p2076_p11 }
  0x4a   : > { %p2072_p10 = pneg %p2071_p2 }
  0x4c   : > { %p2079_p0 = pnand %p2078_p3, %p2072_p10 }
  0x4e   : > { %2082 = shalt.err (!%p2079_p0)
}
  0x4f   : > { %1888 = dma.hbm_to_vmem [thread:$0]  (!%p2366_p4), %s2767_s6, 256, %s305_s4, [#allocation13], %s2804_s20, %s2804_s20, %s2803_s17  }
  0x50   : > { %s1743_s26 = sshll.u32 %s2372_s23, 2  ;;  %s1744_s14 = sshll.u32 %s2223_s9, 6 }
  0x51   : > { %s331_s27 = scalar_lea.hbm %s2761_s0, %s1744_s14  ;;  %s325_s21 = scalar_lea.vmem [#allocation6], %s1743_s26 }
  0x52   : > { %s333_s16 = sshll.u32 %s325_s21, 4  ;;  %s322_s22 = scalar_lea.sflag [#allocation7], %s2372_s23  ;;  %s334_s16 = int_to_ptr.vmem [resolvable:$true] %s333_s16 }
  0x53   : > { %s2096_s2 = scalar_lea.vmem %s334_s16, 64  ;;  %s2234_s7 = smov [#allocation6]  }
  0x54   : > { %p2097_p6 = scmp.ne.s32.totalorder %s334_s16, %s2096_s2  ;;  %s2101_s4 = sshll.u32 %s2234_s7, 4  ;;  %s2102_s4 = int_to_ptr.vmem [resolvable:$false] %s2101_s4 }
  0x55   : > { %s2103_s8 = scalar_lea.vmem %s2102_s4, 128  ;;  %p2104_p4 = scmp.lt.s32.totalorder %s334_s16, %s2102_s4 }
  0x56   : > { %p2099_p1 = pnand %p2097_p6, %p2031_p5  ;;  %p2105_p10 = scmp.lt.s32.totalorder %s2103_s8, %s2096_s2 }
  0x58   : > { %p2100_p2 = pneg %p2099_p1  ;;  %p2106_p11 = por %p2105_p10, %p2104_p4 }
  0x5a   : > { %p2107_p13 = pnand %p2106_p11, %p2100_p2 }
  0x5c   : > { %2110 = shalt.err (!%p2107_p13)
}
  0x5d   : > { %1892 = dma.hbm_to_vmem [thread:$0]  (!%p2399_p9), %s331_s27, 64, %s334_s16, %s322_s22  }
  0x5e   : > { %s2124_s23 = scalar_lea.vmem %s2450_s19, 256  ;;  %s2235_s26 = smov [#allocation11]  }
  0x5f   : > { %p2125_p3 = scmp.ne.s32.totalorder %s2450_s19, %s2124_s23  ;;  %s2129_s14 = sshll.u32 %s2235_s26, 4  ;;  %s2130_s14 = int_to_ptr.vmem [resolvable:$false] %s2129_s14 }
  0x60   : > { %s2131_s2 = scalar_lea.vmem %s2130_s14, 512  ;;  %p2132_p1 = scmp.lt.s32.totalorder %s2450_s19, %s2130_s14 }
  0x61   : > { %p2127_p0 = pnand %p2125_p3, %p2031_p5  ;;  %p2133_p2 = scmp.lt.s32.totalorder %s2131_s2, %s2124_s23 }
  0x63   : > { %p2128_p6 = pneg %p2127_p0  ;;  %p2134_p4 = por %p2133_p2, %p2132_p1 }
  0x65   : > { %p2135_p10 = pnand %p2134_p4, %p2128_p6 }
  0x67   : > { %2138 = shalt.err (!%p2135_p10)
}
  0x68   : > { %1898 = dma.hbm_to_vmem [thread:$0]  (!%p2399_p9), %s2432_s1, 256, %s2450_s19, %s2416_s12, %s2804_s20, %s2804_s20, %s2803_s17  }
  0x69   : > { %395 = sbr.rel (%p2356_p12) target bundleno = 1608 (0x648), region = 52  ;;  %s2475_s24 = sand.u32 (!%p2356_p12), 1, %s2211_s28  }
  0x6a   : > { %s1752_s25 = sshll.u32 (!%p2356_p12), %s2475_s24, 2  ;;  %s398_s27 = scalar_lea.sflag (!%p2356_p12), [#allocation7], %s2475_s24 }
  0x6b   : > { %s401_s21 = scalar_lea.vmem (!%p2356_p12), [#allocation6], %s1752_s25 }
  0x6e   : > { %2190 = dma.done.wait (%p2342_p7), %s398_s27, 64  }
  0x6f   : > { %2192 = vsyncadd (%p2342_p7), %s398_s27, 4294967232  ;;  %s406_s1 = sand.u32 1, %s2325_s11   ;;  %s1753_s13 = sshll.u32 %s2475_s24, 4 }
  0x70   : > { %s407_s18 = scalar_lea.sflag [#allocation10], %s406_s1  ;;  %s2485_s12 = scalar_lea.vmem [#allocation9], %s1753_s13 }
  0x71   : > { %2194 = dma.done.wait (%p2342_p7), %s407_s18, 512  }
  0x72   : > { %2196 = vsyncadd (%p2342_p7), %s407_s18, 4294966784  ;;  %s2491_s19 = scalar_lea.vmem [#allocation11], %s1753_s13  ;;  %p2806_p12 = scmp.eq.s32.totalorder %s2325_s11, 0 }
  0x74   : > { %2198 = dma.done.wait (%p2806_p12), [#allocation13], 512   ;;  %p2807_p9 = pmov %p2806_p12 }
  0x75   : > { %v2236_v0 = vmov 0.0   ;;  %vm2237_vm0 = vmmov 0   ;;  %v1975_v1 = vld [vmem:[#allocation12 + $0x8] sm:$0xff]   ;;  %v1976_v2 = vld [vmem:[#allocation12] sm:$0xff]   ;;  %v487_v3 = vld [vmem:[%s401_s21] sm:$0xf]  ;;  %v566_v18 = vlaneseq }
  0x76   : > { %2200 = vsyncadd (%p2807_p9), [#allocation13], 4294966784  ;;  %1802 = vmatprep.subr.bf16.mxu0 %v2236_v0  ;;  %1806 = vmatprep.mubr.msk.bf16.mxu0 %vm2237_vm0, %v2236_v0  ;;  %vm511_vm1 = vcmask 261120   ;;  %v2238_v4 = vmov 0   ;;  %v1758_v5 = vld [vmem:[%s2766_s5] ss:$0 sm:$0xff] }
  0x77   : > { %1810 = vmatprep.subr.bf16.mxu1 %v2236_v0  ;;  %1812 = vmatprep.mubr.msk.bf16.mxu1 %vm2237_vm0, %v2236_v0  ;;  %s2239_s17 = smov 104   ;;  %s2240_s20 = smov 120   ;;  %vm742_vm2 = vcmask 64512   ;;  %v747_v12 = vld [vmem:[%s2485_s12] sm:$0xf]  ;;  %v2527_v22 = vshrl.u32 %v566_v18, 7 }
  0x78   : > { %1803 = vmatpush3.bf16.msra.mxu0 %v1975_v1  ;;  %1973 = vset.pattern.permute.xlu0 %v2238_v4  ;;  %s2241_s16 = smov 112   ;;  %v764_v13 = vsel %vm742_vm2, %v747_v12, 0  ;;  %743 = vst.msk [vmem:[#allocation5] sm:$0xff] %vm742_vm2, %v2236_v0  ;;  %744 = vst.msk [vmem:[#allocation5 + $0x8] sm:$0xff] %vm742_vm2, %v2236_v0  ;;  %v748_v14 = vld [vmem:[%s2485_s12 + $0x4] sm:$0xf] }
  0x79   : > { %1804 = vmatprep.subr.bf16.mxu0 %v2236_v0  ;;  %1974 = vset.pattern.permute.xlu1 %v2238_v4  ;;  %745 = vst.msk [vmem:[#allocation5 + $0x10] sm:$0xff] %vm742_vm2, %v2236_v0  ;;  %746 = vst.msk [vmem:[#allocation5 + $0x18] sm:$0xff] %vm742_vm2, %v2236_v0  ;;  %v810_v15 = vsel %vm742_vm2, %v748_v14, 0  ;;  %v2242_v16 = vmov 1983009808   ;;  %vm728_vm3 = vcmask 60416  }
  0x7a   : > { %1811 = vmatpush3.bf16.xpose.msra.mxu1 %v764_v13  ;;  %v564_v17 = vunpack.c.l.s4 %v2242_v16  ;;  %v2243_v19 = vmov 1934713408   ;;  %vm733_vm4 = vcmask 7168   ;;  %p476_p7 = scmp.lt.s32.totalorder %s2219_s30, 1  ;;  %vm1084_vm7 = vcmask 1043456   ;;  %s2245_s23 = smov 8  }
  0x7b   : > { %1822 = vmatprep.subr.bf16.mxu1 %v2236_v0  ;;  %v581_v20 = vunpack.c.l.s4 %v2243_v19  ;;  %738 = vst.msk [vmem:[#allocation4] sm:$0xff] %vm733_vm4, %v2236_v0  ;;  %739 = vst.msk [vmem:[#allocation4 + $0x8] sm:$0xff] %vm733_vm4, %v2236_v0  ;;  %s2246_s26 = smov 16   ;;  %s2247_s14 = smov 24   ;;  %vm1488_vm8 = vcmask 130048   ;;  %vm1491_vm9 = vcmask 195584  }
  0x7c   : > { %1805 = vmatpush3.bf16.msra.mxu0 %v1976_v2  ;;  %v565_v21 = vunpack.c.0.s8 %v564_v17  ;;  %740 = vst.msk [vmem:[#allocation4 + $0x10] sm:$0xff] %vm733_vm4, %v2236_v0  ;;  %741 = vst.msk [vmem:[#allocation4 + $0x18] sm:$0xff] %vm733_vm4, %v2236_v0  ;;  %s477_s22 = scalar_select %p476_p7, %s2219_s30, 1 }
  0x7d   : > { %1816 = vmatprep.subr.bf16.mxu0 %v2236_v0  ;;  %v582_v23 = vunpack.c.0.s8 %v581_v20  ;;  %s1757_s25 = sshll.u32 %s2475_s24, 3  ;;  %s2809_s1 = sld [smem:[#allocation28_spill]] }
  0x7e   : > { %v2530_v24 = vsub.s32 %v565_v21, %v2527_v22  ;;  %v749_v21 = vld [vmem:[%s2485_s12 + $0x8] sm:$0xf]  ;;  %s481_s8 = scalar_lea.vmem %s2764_s3, %s477_s22  ;;  %s1775_s13 = sshll.u32 %s2219_s30, 7 }
  0x7f   : > { %1807 = vmatmul.mubr.msk.bf16.vlgmr.msra.gmra.mxu0 %vm511_vm1, %v487_v3  ;;  %v2534_v28 = vsub.s32 %v582_v23, %v2527_v22  ;;  %v750_v23 = vld [vmem:[%s2485_s12 + $0xc] sm:$0xf]  ;;  %s475_s18 = scalar_lea.vmem [#allocation15], %s1757_s25  ;;  %s2810_s15 = sld [smem:[#allocation29_spill]] }
  0x80   : > { %1818 = vmatprep.mubr.msk.bf16.mxu0 %vm2237_vm0, %v2236_v0  ;;  %1817 = vmatpush3.bf16.xpose.msra.mxu0 %v810_v15  ;;  %s1576_s12 = sshll.u32 %s475_s18, 4  ;;  %s2714_s12 = int_to_ptr.vmem [resolvable:$true] %s1576_s12 }
  0x81   : > { %1828 = vmatprep.subr.bf16.mxu0 %v2236_v0  ;;  %s2139_s30 = scalar_lea.vmem %s2714_s12, 128 }
  0x82   : > { %p2140_p5 = scmp.ne.s32.totalorder %s2714_s12, %s2139_s30 }
  0x84   : > { %p2141_p11 = pnand %p2140_p5, %p2346_p8 }
  0x86   : > { %p2142_p13 = pneg %p2141_p11 }
 0x13f   : > { %v549_v6 = vpop.f32.mrf.mxu0 }
 0x140   : > { %v550_v7 = vadd.f32 %v1758_v5, %v549_v6 }
 0x141   : > { %v1808_v8 = vpop.f32.mrf.mxu0 }
 0x142   : > { %v555_v9 = vpack.c.bf16 %v550_v7, %v550_v7 }
 0x143   : > { %v552_v10 = vpop.f32.mrf.mxu0 }
 0x144   : > { %561 = vrot.lane.b32.xlu1 %v555_v9, %s2239_s17  ;;  %557 = vrot.lane.b32.xlu0 %v555_v9, %s2240_s20  ;;  %v569_v35 = vrot.slane %v555_v9, %v2530_v24  ;;  %s2712_s17 = scalar_lea.hbm %s2810_s15, %s1775_s13  ;;  %s1562_s20 = scalar_lea.sflag [#allocation8], %s2475_s24 }
 0x145   : > { %v1809_v11 = vpop.f32.mrf.mxu0 }
 0x148   : > { %559 = vrot.lane.b32.xlu0 %v555_v9, %s2241_s16  ;;  %s2248_s16 = smov [#allocation15]  }
 0x149   : > { %s2143_s22 = sshll.u32 %s2248_s16, 4  ;;  %s2144_s22 = int_to_ptr.vmem [resolvable:$false] %s2143_s22 }
 0x14a   : > { %s2145_s7 = scalar_lea.vmem %s2144_s22, 256  ;;  %p2146_p3 = scmp.lt.s32.totalorder %s2714_s12, %s2144_s22 }
 0x14b   : > { %p2147_p0 = scmp.lt.s32.totalorder %s2145_s7, %s2139_s30 }
 0x14d   : > { %p2148_p6 = por %p2147_p0, %p2146_p3 }
 0x14f   : > { %p2149_p1 = pnand %p2148_p6, %p2142_p13 }
 0x1b6   : > { %v562_v25 = vpop.permute.xlu1 %561  ;;  %v558_v26 = vpop.permute.xlu0 %557 }
 0x1b7   : > { %v611_v27 = vrot.slane %v562_v25, %v2530_v24  ;;  %v603_v29 = vrot.slane %v558_v26, %v2530_v24  ;;  %v856_v25 = vsel %vm742_vm2, %v749_v21, 0 }
 0x1b9   : > { %v612_v30 = vcombine.low %v603_v29, %v611_v27  ;;  %v613_v31 = vcombine.high %v603_v29, %v611_v27  ;;  %v902_v27 = vsel %vm742_vm2, %v750_v23, 0 }
 0x1ba   : > { %v560_v32 = vpop.permute.xlu0 %559 }
 0x1bb   : > { %v620_v33 = vrot.slane %v612_v30, %v2534_v28  ;;  %v577_v34 = vrot.slane %v560_v32, %v2530_v24  ;;  %v627_v36 = vrot.slane %v613_v31, %v2534_v28  ;;  %v2244_v32 = vmov -1e+30  }
 0x1bc   : > { %734 = vst.msk [vmem:[#allocation3] sm:$0xff] %vm733_vm4, %v2244_v32  ;;  %735 = vst.msk [vmem:[#allocation3 + $0x8] sm:$0xff] %vm733_vm4, %v2244_v32 }
 0x1bd   : > { %v578_v37 = vcombine.low %v569_v35, %v577_v34  ;;  %v579_v38 = vcombine.high %v569_v35, %v577_v34  ;;  %v628_v39 = vcombine.high %v620_v33, %v2238_v4  ;;  %v629_v42 = vcombine.high %v627_v36, %v2238_v4  ;;  %736 = vst.msk [vmem:[#allocation3 + $0x10] sm:$0xff] %vm733_vm4, %v2244_v32 }
 0x1be   : > { %v635_v43 = vshrl.u32 %v620_v33, 16  ;;  %v651_v49 = vshrl.u32 %v627_v36, 16  ;;  %737 = vst.msk [vmem:[#allocation3 + $0x18] sm:$0xff] %vm733_vm4, %v2244_v32  ;;  %v949_v34 = vsub.s32 0, %v2527_v22 }
 0x1bf   : > { %v586_v40 = vrot.slane %v578_v37, %v2534_v28  ;;  %v593_v41 = vrot.slane %v579_v38, %v2534_v28  ;;  %v643_v48 = vshrl.u32 %v628_v39, 16  ;;  %v659_v56 = vshrl.u32 %v629_v42, 16 }
 0x1c1   : > { %v594_v44 = vcombine.high %v586_v40, %v2238_v4  ;;  %v595_v45 = vcombine.high %v593_v41, %v2238_v4  ;;  %v632_v46 = vpack.i.b16 %v620_v33, %v586_v40  ;;  %v634_v47 = vshrl.u32 %v586_v40, 16  ;;  %v944_v33 = vld [vmem:[%s481_s8] sm:$0x1] }
 0x1c2   : > { %v648_v50 = vpack.i.b16 %v627_v36, %v593_v41  ;;  %v650_v51 = vshrl.u32 %v593_v41, 16  ;;  %vm945_vm5 = vcmp.gt.f32.partialorder %v944_v33, 0.0  ;;  %v753_v33 = vld [vmem:[%s2491_s19 + $0x8] sm:$0xf] }
 0x1c3   : > { %v636_v52 = vpack.i.b16 %v635_v43, %v634_v47  ;;  %v640_v53 = vpack.i.b16 %v628_v39, %v594_v44  ;;  %v642_v54 = vshrl.u32 %v594_v44, 16  ;;  %v656_v55 = vpack.i.b16 %v629_v42, %v595_v45 }
 0x1c4   : > { %v652_v57 = vpack.i.b16 %v651_v49, %v650_v51  ;;  %v658_v58 = vshrl.u32 %v595_v45, 16  ;;  %v662_v59 = vcombine.low %v632_v46, %v648_v50  ;;  %v946_v35 = vsel %vm945_vm5, 1, %v2238_v4 }
 0x1c5   : > { %v644_v60 = vpack.i.b16 %v643_v48, %v642_v54  ;;  %v670_v61 = vcombine.low %v640_v53, %v656_v55  ;;  %v950_v36 = vrot.slane %v946_v35, %v949_v34  ;;  %v754_v35 = vld [vmem:[%s2491_s19 + $0xc] sm:$0xf] }
 0x1c6   : > { %v660_v62 = vpack.i.b16 %v659_v56, %v658_v58  ;;  %v687_v63 = vcombine.low %v636_v52, %v652_v57  ;;  %v669_v1 = vrot.slane %v662_v59, %v2530_v24 }
 0x1c7   : > { %v677_v2 = vrot.slane %v670_v61, %v2530_v24  ;;  %vm951_vm6 = vcmp.eq.s32.totalorder %v950_v36, 1 }
 0x1c8   : > { %v695_v3 = vcombine.low %v644_v60, %v660_v62  ;;  %v694_v6 = vrot.slane %v687_v63, %v2530_v24  ;;  %v2603_v60 = vld [vmem:[#allocation3] sm:$0xff]  ;;  %v2605_v62 = vld [vmem:[#allocation3 + $0x8] sm:$0xff] }
 0x1c9   : > { %v678_v5 = vcombine.low %v669_v1, %v677_v2 }
 0x1ca   : > { %v702_v7 = vrot.slane %v695_v3, %v2530_v24 }
 0x1cb   : > { %v685_v8 = vrot.slane %v678_v5, %v2534_v28 }
 0x1cc   : > { %v703_v9 = vcombine.low %v694_v6, %v702_v7  ;;  %v2618_v6 = vld [vmem:[#allocation3 + $0x10] sm:$0xff] }
 0x1cd   : > { %v686_v10 = vcombine.high %v685_v8, %v2238_v4  ;;  %v716_v14 = vshrl.u32 %v685_v8, 16 }
 0x1ce   : > { %v710_v11 = vrot.slane %v703_v9, %v2534_v28 }
 0x1cf   : > { %v724_v18 = vshrl.u32 %v686_v10, 16 }
 0x1d0   : > { %v711_v12 = vcombine.high %v710_v11, %v2238_v4  ;;  %v714_v13 = vpack.i.b16 %v710_v11, %v685_v8  ;;  %v717_v15 = vshrl.u32 %v710_v11, 16  ;;  %v2620_v8 = vld [vmem:[#allocation3 + $0x18] sm:$0xff] }
 0x1d2   : > { %v718_v16 = vpack.i.b16 %v717_v15, %v716_v14  ;;  %v722_v17 = vpack.i.b16 %v711_v12, %v686_v10  ;;  %v725_v19 = vshrl.u32 %v711_v12, 16  ;;  %729 = vst.msk [vmem:[#allocation2] sm:$0xf] %vm728_vm3, %v714_v13  ;;  %v751_v14 = vld [vmem:[%s2491_s19] sm:$0xf] }
 0x1d3   : > { %v1086_v15 = vsel %vm1084_vm7, %v751_v14, 0 }
 0x1d4   : > { %v726_v20 = vpack.i.b16 %v725_v19, %v724_v18  ;;  %730 = vst.msk [vmem:[#allocation2 + $0x4] sm:$0xf] %vm728_vm3, %v718_v16  ;;  %731 = vst.msk [vmem:[#allocation2 + $0x8] sm:$0xf] %vm728_vm3, %v722_v17  ;;  %v752_v16 = vld [vmem:[%s2491_s19 + $0x4] sm:$0xf] }
 0x1d5   : > { %v1132_v17 = vsel %vm1084_vm7, %v752_v16, 0 }
 0x1d6   : > { %732 = vst.msk [vmem:[#allocation2 + $0xc] sm:$0xf] %vm728_vm3, %v726_v20 }
 0x1d9   : > { %v755_v26 = vld [vmem:[#allocation2] sm:$0xf] }
 0x1da   : > { %1813 = vmatmul.mubr.msk.bf16.vlgmr.msra.gmra.mxu1 %vm742_vm2, %v755_v26 }
 0x1db   : > { %1823 = vmatpush3.bf16.xpose.msra.mxu1 %v856_v25  ;;  %v756_v29 = vld [vmem:[#allocation2 + $0x4] sm:$0xf]  ;;  %1824 = vmatprep.mubr.msk.bf16.mxu1 %vm2237_vm0, %v2236_v0  ;;  %v757_v30 = vld [vmem:[#allocation2 + $0x8] sm:$0xf] }
 0x1dc   : > { %1819 = vmatmul.mubr.msk.bf16.vlgmr.msra.gmra.mxu0 %vm742_vm2, %v756_v29  ;;  %1834 = vmatprep.subr.bf16.mxu1 %v2236_v0 }
 0x1dd   : > { %1829 = vmatpush3.bf16.xpose.msra.mxu0 %v902_v27  ;;  %1830 = vmatprep.mubr.msk.bf16.mxu0 %vm2237_vm0, %v2236_v0  ;;  %v758_v31 = vld [vmem:[#allocation2 + $0xc] sm:$0xf] }
 0x1de   : > { %1840 = vmatprep.subr.bf16.mxu0 %v2236_v0 }
 0x1e2   : > { %1825 = vmatmul.mubr.msk.bf16.vlgmr.msra.gmra.mxu1 %vm742_vm2, %v757_v30 }
 0x1e3   : > { %1836 = vmatprep.mubr.msk.bf16.mxu1 %vm2237_vm0, %v2236_v0  ;;  %1835 = vmatpush3.bf16.msra.mxu1 %v1086_v15 }
 0x1e4   : > { %1831 = vmatmul.mubr.msk.bf16.vlgmr.msra.gmra.mxu0 %vm742_vm2, %v758_v31  ;;  %1846 = vmatprep.subr.bf16.mxu1 %v2236_v0 }
 0x1e5   : > { %1842 = vmatprep.mubr.msk.bf16.mxu0 %vm2237_vm0, %v2236_v0  ;;  %1841 = vmatpush3.bf16.msra.mxu0 %v1132_v17 }
 0x1e6   : > { %1852 = vmatprep.subr.bf16.mxu0 %v2236_v0 }
 0x29a   : > { %v800_v37 = vpop.f32.mrf.mxu1 }
 0x29b   : > { %v2593_v38 = vsel %vm951_vm6, %v800_v37, -1e+30 }
 0x29c   : > { %v1814_v39 = vpop.f32.mrf.mxu1  ;;  %v846_v40 = vpop.f32.mrf.mxu0  ;;  %v960_v41 = vsel %vm742_vm2, %v2593_v38, -inf }
 0x29d   : > { %v953_v42 = vsel %vm951_vm6, %v846_v40, -1e+30  ;;  %961 = vmax.xlane.f32.xlu1 %v960_v41 }
 0x29e   : > { %v803_v43 = vpop.f32.mrf.mxu1  ;;  %v1820_v44 = vpop.f32.mrf.mxu0  ;;  %v963_v22 = vsel %vm742_vm2, %v953_v42, -inf }
 0x29f   : > { %964 = vmax.xlane.f32.xlu0 %v963_v22 }
 0x2a0   : > { %v1815_v45 = vpop.f32.mrf.mxu1  ;;  %v849_v46 = vpop.f32.mrf.mxu0 }
 0x2a2   : > { %v1821_v47 = vpop.f32.mrf.mxu0  ;;  %v892_v48 = vpop.f32.mrf.mxu1 }
 0x2a3   : > { %v954_v49 = vsel %vm951_vm6, %v892_v48, -1e+30 }
 0x2a4   : > { %v1826_v50 = vpop.f32.mrf.mxu1  ;;  %v938_v51 = vpop.f32.mrf.mxu0  ;;  %v966_v52 = vsel %vm742_vm2, %v954_v49, -inf }
 0x2a5   : > { %v955_v53 = vsel %vm951_vm6, %v938_v51, -1e+30  ;;  %967 = vmax.xlane.f32.xlu0 %v966_v52 }
 0x2a6   : > { %v895_v54 = vpop.f32.mrf.mxu1  ;;  %v1832_v55 = vpop.f32.mrf.mxu0  ;;  %v969_v56 = vsel %vm742_vm2, %v955_v53, -inf }
 0x2a7   : > { %970 = vmax.xlane.f32.xlu1 %v969_v56  ;;  %v1020_v56 = vld [vmem:[#allocation4] sm:$0xff] }
 0x2a8   : > { %v1827_v57 = vpop.f32.mrf.mxu1  ;;  %v941_v58 = vpop.f32.mrf.mxu0 }
 0x2a9   : > { %v1021_v57 = vld [vmem:[#allocation4 + $0x8] sm:$0xff] }
 0x2aa   : > { %v1833_v59 = vpop.f32.mrf.mxu0 }
 0x326   : > { %v962_v61 = vpop.xlane.xlu1 %961 }
 0x327   : > { %v2608_v63 = vmax.f32 %v2603_v60, %v962_v61 }
 0x328   : > { %v965_v1 = vpop.xlane.xlu0 %964 }
 0x329   : > { %v976_v2 = vsub.f32 %v2603_v60, %v2608_v63  ;;  %1274 = vst.msk [vmem:[#allocation3] sm:$0xff] %vm733_vm4, %v2608_v63  ;;  %v973_v3 = vmax.f32 %v2605_v62, %v965_v1  ;;  %990 = vperm.xlu0 %1973, %v2608_v63   ;;  %v1022_v1 = vld [vmem:[#allocation4 + $0x10] sm:$0xff] }
 0x32b   : > { %v977_v5 = vsub.f32 %v2605_v62, %v973_v3  ;;  %1275 = vst.msk [vmem:[#allocation3 + $0x8] sm:$0xff] %vm733_vm4, %v973_v3  ;;  %995 = vperm.xlu1 %1974, %v973_v3   ;;  %v980_v47 = vmul.f32 1.442695, %v976_v2 }
 0x32d   : > { %v982_v44 = vmul.f32 1.442695, %v977_v5  ;;  %v1023_v5 = vld [vmem:[#allocation4 + $0x18] sm:$0xff] }
 0x32e   : > { %v968_v7 = vpop.xlane.xlu0 %967 }
 0x32f   : > { %v2623_v9 = vmax.f32 %v2618_v6, %v968_v7 }
 0x330   : > { %v971_v10 = vpop.xlane.xlu1 %970 }
 0x331   : > { %v978_v11 = vsub.f32 %v2618_v6, %v2623_v9  ;;  %1276 = vst.msk [vmem:[#allocation3 + $0x10] sm:$0xff] %vm733_vm4, %v2623_v9  ;;  %v2630_v12 = vmax.f32 %v2620_v8, %v971_v10  ;;  %1000 = vperm.xlu1 %1974, %v2623_v9  }
 0x333   : > { %v979_v13 = vsub.f32 %v2620_v8, %v2630_v12  ;;  %1277 = vst.msk [vmem:[#allocation3 + $0x18] sm:$0xff] %vm733_vm4, %v2630_v12  ;;  %v984_v50 = vmul.f32 1.442695, %v978_v11 }
 0x335   : > { %1005 = vperm.xlu1 %1974, %v2630_v12   ;;  %v986_v51 = vmul.f32 1.442695, %v979_v13 }
 0x3a4   : > { %v991_v18 = vpop.permute.xlu0 %990 }
 0x3a5   : > { %v1008_v19 = vsub.f32 %v2593_v38, %v991_v18  ;;  %v1178_v38 = vsel %vm1084_vm7, %v753_v33, 0  ;;  %v1051_v33 = vld [vmem:[#allocation5 + $0x10] sm:$0xff] }
 0x3a6   : > { %v996_v20 = vpop.permute.xlu1 %995 }
 0x3a7   : > { %v1012_v21 = vmul.f32 1.442695, %v1008_v19  ;;  %v1009_v23 = vsub.f32 %v953_v42, %v996_v20  ;;  %v1224_v42 = vsel %vm1084_vm7, %v754_v35, 0  ;;  %v1049_v19 = vld [vmem:[#allocation5] sm:$0xff]  ;;  %v1050_v20 = vld [vmem:[#allocation5 + $0x8] sm:$0xff] }
 0x3a9   : > { %1979 = vpow2.f32 %v1012_v21  ;;  %v1014_v25 = vmul.f32 1.442695, %v1009_v23 }
 0x3ab   : > { %1981 = vpow2.f32 %v1014_v25 }
 0x3ac   : > { %v1001_v26 = vpop.permute.xlu1 %1000 }
 0x3ad   : > { %v1010_v27 = vsub.f32 %v954_v49, %v1001_v26 }
 0x3af   : > { %v1016_v29 = vmul.f32 1.442695, %v1010_v27 }
 0x3b0   : > { %v1006_v30 = vpop.permute.xlu1 %1005 }
 0x3b1   : > { %1983 = vpow2.f32 %v1016_v29  ;;  %v1011_v31 = vsub.f32 %v955_v53, %v1006_v30 }
 0x3b3   : > { %v1018_v32 = vmul.f32 1.442695, %v1011_v31 }
 0x3b5   : > { %1985 = vpow2.f32 %v1018_v32 }
 0x3b6   : > { %v1980_v34 = vpop.eup %1979  ;;  %1987 = vpow2.f32 %v982_v44 }
 0x3b7   : > { %v1028_v36 = vsel %vm742_vm2, %v1980_v34, 0.0  ;;  %v1077_v37 = vpack.c.bf16 %v1980_v34, %v1980_v34  ;;  %1989 = vpow2.f32 %v980_v47 }
 0x3b8   : > { %v1982_v39 = vpop.eup %1981  ;;  %1029 = vadd.xlane.f32.xlu1 %v1028_v36  ;;  %1991 = vpow2.f32 %v984_v50 }
 0x3b9   : > { %1837 = vmatmul.mubr.msk.bf16.vlgmr.msra.gmra.mxu1 %vm742_vm2, %v1077_v37  ;;  %v1031_v40 = vsel %vm742_vm2, %v1982_v39, 0.0  ;;  %v1078_v41 = vpack.c.bf16 %v1982_v39, %v1982_v39  ;;  %1993 = vpow2.f32 %v986_v51 }
 0x3ba   : > { %1032 = vadd.xlane.f32.xlu0 %v1031_v40  ;;  %1847 = vmatpush3.bf16.msra.mxu1 %v1178_v38  ;;  %v1052_v40 = vld [vmem:[#allocation5 + $0x18] sm:$0xff] }
 0x3bb   : > { %1843 = vmatmul.mubr.msk.bf16.vlgmr.msra.gmra.mxu0 %vm742_vm2, %v1078_v41  ;;  %1848 = vmatprep.mubr.msk.bf16.mxu1 %vm2237_vm0, %v2236_v0 }
 0x3bc   : > { %1853 = vmatpush3.bf16.msra.mxu0 %v1224_v42  ;;  %1854 = vmatprep.mubr.msk.bf16.mxu0 %vm2237_vm0, %v2236_v0 }
 0x3bd   : > { %1858 = vmatprep.subr.bf16.mxu1 %v2236_v0 }
 0x3be   : > { %v1984_v43 = vpop.eup %1983 }
 0x3bf   : > { %v1034_v22 = vsel %vm742_vm2, %v1984_v43, 0.0  ;;  %v1079_v45 = vpack.c.bf16 %v1984_v43, %v1984_v43 }
 0x3c0   : > { %1035 = vadd.xlane.f32.xlu1 %v1034_v22 }
 0x3c1   : > { %1849 = vmatmul.mubr.msk.bf16.vlgmr.msra.gmra.mxu1 %vm742_vm2, %v1079_v45  ;;  %v1977_v45 = vld [vmem:[#allocation14 + $0x8] sm:$0xff]  }
 0x3c2   : > { %v1986_v46 = vpop.eup %1985  ;;  %1862 = vmatprep.mubr.msk.bf16.mxu1 %vm2237_vm0, %v2236_v0  ;;  %1859 = vmatpush3.bf16.msra.mxu1 %v1977_v45  ;;  %v1978_v45 = vld [vmem:[#allocation14] sm:$0xff]  }
 0x3c3   : > { %v1037_v48 = vsel %vm742_vm2, %v1986_v46, 0.0  ;;  %v1080_v49 = vpack.c.bf16 %v1986_v46, %v1986_v46  ;;  %v1988_v52 = vpop.eup %1987  ;;  %1860 = vmatprep.subr.bf16.mxu1 %v2236_v0 }
 0x3c4   : > { %1038 = vadd.xlane.f32.xlu1 %v1037_v48  ;;  %v1990_v53 = vpop.eup %1989  ;;  %v1025_v61 = vmul.f32 %v1988_v52, %v1021_v57 }
 0x3c5   : > { %1855 = vmatmul.mubr.msk.bf16.vlgmr.msra.gmra.mxu0 %vm742_vm2, %v1080_v49  ;;  %v1992_v54 = vpop.eup %1991  ;;  %v1024_v58 = vmul.f32 %v1990_v53, %v1020_v56 }
 0x3c6   : > { %v1994_v55 = vpop.eup %1993  ;;  %v1026_v2 = vmul.f32 %v1992_v54, %v1022_v1  ;;  %1861 = vmatpush3.bf16.msra.mxu1 %v1978_v45 }
 0x3c7   : > { %v1027_v8 = vmul.f32 %v1994_v55, %v1023_v5 }
 0x3d0   : > { %1060 = vperm.xlu0 %1973, %v1988_v52  }
 0x3d5   : > { %1055 = vperm.xlu1 %1974, %v1990_v53  }
 0x3d9   : > { %1065 = vperm.xlu1 %1974, %v1992_v54  }
 0x3dd   : > { %1070 = vperm.xlu1 %1974, %v1994_v55  }
 0x441   : > { %v1030_v59 = vpop.xlane.xlu1 %1029 }
 0x442   : > { %v1040_v60 = vadd.f32 %v1030_v59, %v1024_v58 }
 0x443   : > { %v1033_v62 = vpop.xlane.xlu0 %1032 }
 0x444   : > { %1045 = vst.msk [vmem:[#allocation4] sm:$0xff] %vm733_vm4, %v1040_v60  ;;  %v1041_v63 = vadd.f32 %v1033_v62, %v1025_v61 }
 0x446   : > { %1046 = vst.msk [vmem:[#allocation4 + $0x8] sm:$0xff] %vm733_vm4, %v1041_v63 }
 0x449   : > { %v1036_v3 = vpop.xlane.xlu1 %1035 }
 0x44a   : > { %v1042_v6 = vadd.f32 %v1036_v3, %v1026_v2 }
 0x44b   : > { %v1285_v7 = vld [vmem:[#allocation4] sm:$0xff]  ;;  %v1061_v21 = vpop.permute.xlu0 %1060 }
 0x44c   : > { %1047 = vst.msk [vmem:[#allocation4 + $0x10] sm:$0xff] %vm733_vm4, %v1042_v6  ;;  %1995 = vrcp.f32 %v1285_v7  ;;  %v1074_v26 = vmul.f32 %v1061_v21, %v1050_v20 }
 0x44d   : > { %v1039_v9 = vpop.xlane.xlu1 %1038  ;;  %v1286_v10 = vld [vmem:[#allocation4 + $0x8] sm:$0xff] }
 0x44e   : > { %v1043_v11 = vadd.f32 %v1039_v9, %v1027_v8  ;;  %1997 = vrcp.f32 %v1286_v10 }
 0x450   : > { %1048 = vst.msk [vmem:[#allocation4 + $0x18] sm:$0xff] %vm733_vm4, %v1043_v11 }
 0x451   : > { %v1056_v18 = vpop.permute.xlu1 %1055 }
 0x452   : > { %v1073_v23 = vmul.f32 %v1056_v18, %v1049_v19 }
 0x453   : > { %v1287_v12 = vld [vmem:[#allocation4 + $0x10] sm:$0xff] }
 0x454   : > { %1999 = vrcp.f32 %v1287_v12 }
 0x455   : > { %v1066_v27 = vpop.permute.xlu1 %1065 }
 0x456   : > { %v1075_v38 = vmul.f32 %v1066_v27, %v1051_v33 }
 0x457   : > { %v1288_v13 = vld [vmem:[#allocation4 + $0x18] sm:$0xff] }
 0x458   : > { %2001 = vrcp.f32 %v1288_v13 }
 0x459   : > { %v1996_v14 = vpop.eup %1995  ;;  %v1071_v39 = vpop.permute.xlu1 %1070 }
 0x45a   : > { %1295 = vperm.xlu1 %1974, %v1996_v14   ;;  %v1076_v22 = vmul.f32 %v1071_v39, %v1052_v40 }
 0x45b   : > { %v1998_v15 = vpop.eup %1997 }
 0x45c   : > { %1300 = vperm.xlu0 %1973, %v1998_v15  }
 0x461   : > { %v2000_v16 = vpop.eup %1999 }
 0x462   : > { %1305 = vperm.xlu1 %1974, %v2000_v16  }
 0x465   : > { %v2002_v17 = vpop.eup %2001 }
 0x466   : > { %1310 = vperm.xlu0 %1973, %v2002_v17  }
 0x479   : > { %v1122_v25 = vpop.f32.mrf.mxu1 }
 0x47a   : > { %v1266_v29 = vadd.f32 %v1122_v25, %v1073_v23 }
 0x47b   : > { %v1838_v30 = vpop.f32.mrf.mxu1  ;;  %v1168_v31 = vpop.f32.mrf.mxu0 }
 0x47c   : > { %1270 = vst.msk [vmem:[#allocation5] sm:$0xff] %vm742_vm2, %v1266_v29  ;;  %v1267_v32 = vadd.f32 %v1168_v31, %v1074_v26 }
 0x47d   : > { %v1125_v34 = vpop.f32.mrf.mxu1  ;;  %v1844_v35 = vpop.f32.mrf.mxu0 }
 0x47e   : > { %1271 = vst.msk [vmem:[#allocation5 + $0x8] sm:$0xff] %vm742_vm2, %v1267_v32 }
 0x47f   : > { %v1839_v36 = vpop.f32.mrf.mxu1  ;;  %v1171_v37 = vpop.f32.mrf.mxu0 }
 0x481   : > { %v1845_v41 = vpop.f32.mrf.mxu0  ;;  %v1214_v42 = vpop.f32.mrf.mxu1 }
 0x482   : > { %v1268_v43 = vadd.f32 %v1214_v42, %v1075_v38 }
 0x483   : > { %v1850_v44 = vpop.f32.mrf.mxu1  ;;  %v1281_v54 = vld [vmem:[#allocation5] sm:$0xff] }
 0x484   : > { %1272 = vst.msk [vmem:[#allocation5 + $0x10] sm:$0xff] %vm742_vm2, %v1268_v43 }
 0x485   : > { %v1217_v46 = vpop.f32.mrf.mxu1  ;;  %v1260_v47 = vpop.f32.mrf.mxu0  ;;  %v1282_v60 = vld [vmem:[#allocation5 + $0x8] sm:$0xff] }
 0x486   : > { %v1269_v48 = vadd.f32 %v1260_v47, %v1076_v22 }
 0x487   : > { %v1851_v49 = vpop.f32.mrf.mxu1  ;;  %v1856_v50 = vpop.f32.mrf.mxu0 }
 0x488   : > { %1273 = vst.msk [vmem:[#allocation5 + $0x18] sm:$0xff] %vm742_vm2, %v1269_v48 }
 0x489   : > { %v1263_v51 = vpop.f32.mrf.mxu0 }
 0x48b   : > { %v1857_v52 = vpop.f32.mrf.mxu0  ;;  %v1283_v57 = vld [vmem:[#allocation5 + $0x10] sm:$0xff] }
 0x48f   : > { %v1284_v2 = vld [vmem:[#allocation5 + $0x18] sm:$0xff] }
 0x4d5   : > { %v1296_v53 = vpop.permute.xlu1 %1295 }
 0x4d6   : > { %v1313_v55 = vmul.f32 %v1296_v53, %v1281_v54 }
 0x4d7   : > { %v1301_v56 = vpop.permute.xlu0 %1300 }
 0x4d8   : > { %v1317_v59 = vpack.c.bf16 %v1313_v55, %v1313_v55  ;;  %v1314_v62 = vmul.f32 %v1301_v56, %v1282_v60 }
 0x4da   : > { %v1324_v3 = vrot.slane %v1317_v59, %v2530_v24  ;;  %v1351_v6 = vpack.c.bf16 %v1314_v62, %v1314_v62 }
 0x4dc   : > { %v1358_v12 = vrot.slane %v1351_v6, %v2530_v24 }
 0x4dd   : > { %v1306_v58 = vpop.permute.xlu1 %1305 }
 0x4de   : > { %v1315_v61 = vmul.f32 %v1306_v58, %v1283_v57 }
 0x4e0   : > { %v1325_v63 = vpack.c.bf16 %v1315_v61, %v1315_v61 }
 0x4e1   : > { %v1311_v1 = vpop.permute.xlu0 %1310 }
 0x4e2   : > { %v1332_v0 = vrot.slane %v1325_v63, %v2530_v24  ;;  %v1316_v5 = vmul.f32 %v1311_v1, %v1284_v2 }
 0x4e4   : > { %v1333_v7 = vcombine.low %v1324_v3, %v1332_v0  ;;  %v1334_v8 = vcombine.high %v1324_v3, %v1332_v0  ;;  %v1359_v9 = vpack.c.bf16 %v1316_v5, %v1316_v5  ;;  %v1770_v3 = vld [vmem:[%s2809_s1] ss:$0 sm:$0xff] }
 0x4e6   : > { %v1341_v10 = vrot.slane %v1333_v7, %v2534_v28  ;;  %v1366_v11 = vrot.slane %v1359_v9, %v2530_v24  ;;  %v1348_v13 = vrot.slane %v1334_v8, %v2534_v28 }
 0x4e8   : > { %v1367_v14 = vcombine.low %v1358_v12, %v1366_v11  ;;  %v1368_v15 = vcombine.high %v1358_v12, %v1366_v11  ;;  %v1349_v16 = vcombine.high %v1341_v10, %v2238_v4  ;;  %v1350_v19 = vcombine.high %v1348_v13, %v2238_v4 }
 0x4e9   : > { %v1389_v20 = vshrl.u32 %v1341_v10, 16  ;;  %v1405_v29 = vshrl.u32 %v1348_v13, 16 }
 0x4ea   : > { %v1375_v17 = vrot.slane %v1367_v14, %v2534_v28  ;;  %v1382_v18 = vrot.slane %v1368_v15, %v2534_v28  ;;  %v1397_v27 = vshrl.u32 %v1349_v16, 16  ;;  %v1413_v36 = vshrl.u32 %v1350_v19, 16 }
 0x4ec   : > { %v1383_v21 = vcombine.high %v1375_v17, %v2238_v4  ;;  %v1384_v23 = vcombine.high %v1382_v18, %v2238_v4  ;;  %v1387_v25 = vpack.i.b16 %v1375_v17, %v1341_v10  ;;  %v1390_v26 = vshrl.u32 %v1375_v17, 16 }
 0x4ed   : > { %v1403_v30 = vpack.i.b16 %v1382_v18, %v1348_v13  ;;  %v1406_v31 = vshrl.u32 %v1382_v18, 16 }
 0x4ee   : > { %v1391_v32 = vpack.i.b16 %v1390_v26, %v1389_v20  ;;  %v1395_v33 = vpack.i.b16 %v1383_v21, %v1349_v16  ;;  %v1398_v34 = vshrl.u32 %v1383_v21, 16  ;;  %v1411_v35 = vpack.i.b16 %v1384_v23, %v1350_v19 }
 0x4ef   : > { %v1407_v37 = vpack.i.b16 %v1406_v31, %v1405_v29  ;;  %v1414_v38 = vshrl.u32 %v1384_v23, 16  ;;  %v1417_v39 = vcombine.low %v1387_v25, %v1403_v30 }
 0x4f0   : > { %v1399_v40 = vpack.i.b16 %v1398_v34, %v1397_v27  ;;  %v1425_v41 = vcombine.low %v1395_v33, %v1411_v35 }
 0x4f1   : > { %v1415_v42 = vpack.i.b16 %v1414_v38, %v1413_v36  ;;  %v1442_v43 = vcombine.low %v1391_v32, %v1407_v37  ;;  %v1424_v44 = vrot.slane %v1417_v39, %v2530_v24 }
 0x4f2   : > { %v1432_v22 = vrot.slane %v1425_v41, %v2530_v24 }
 0x4f3   : > { %v1450_v46 = vcombine.low %v1399_v40, %v1415_v42  ;;  %v1449_v48 = vrot.slane %v1442_v43, %v2530_v24 }
 0x4f4   : > { %v1433_v47 = vcombine.low %v1424_v44, %v1432_v22 }
 0x4f5   : > { %v1457_v49 = vrot.slane %v1450_v46, %v2530_v24 }
 0x4f6   : > { %v1440_v50 = vrot.slane %v1433_v47, %v2534_v28 }
 0x4f7   : > { %v1458_v51 = vcombine.low %v1449_v48, %v1457_v49 }
 0x4f8   : > { %v1470_v53 = vshrl.u32 %v1440_v50, 16  ;;  %v1441_v55 = vcombine.high %v1440_v50, %v2238_v4 }
 0x4f9   : > { %v1465_v52 = vrot.slane %v1458_v51, %v2534_v28 }
 0x4fa   : > { %v1476_v24 = vshrl.u32 %v1441_v55, 16 }
 0x4fb   : > { %v1471_v54 = vshrl.u32 %v1465_v52, 16  ;;  %v1466_v56 = vcombine.high %v1465_v52, %v2238_v4  ;;  %v1469_v57 = vpack.i.b16 %v1465_v52, %v1440_v50 }
 0x4fd   : > { %v1472_v58 = vpack.i.b16 %v1471_v54, %v1470_v53  ;;  %v1475_v59 = vpack.i.b16 %v1466_v56, %v1441_v55  ;;  %v1477_v60 = vshrl.u32 %v1466_v56, 16 }
 0x4ff   : > { %1479 = vrot.lane.b32.xlu1 %v1472_v58, %s2245_s23  ;;  %1481 = vrot.lane.b32.xlu0 %v1475_v59, %s2246_s26  ;;  %v1478_v61 = vpack.i.b16 %v1477_v60, %v1476_v24 }
 0x503   : > { %1483 = vrot.lane.b32.xlu1 %v1478_v61, %s2247_s14 }
 0x571   : > { %v1480_v28 = vpop.permute.xlu1 %1479  ;;  %v1482_v63 = vpop.permute.xlu0 %1481 }
 0x572   : > { %v1487_v62 = vsel %vm742_vm2, %v1469_v57, %v1480_v28 }
 0x573   : > { %v1490_v4 = vsel %vm1488_vm8, %v1487_v62, %v1482_v63 }
 0x575   : > { %v1484_v1 = vpop.permute.xlu1 %1483 }
 0x576   : > { %v1493_v2 = vsel %vm1491_vm9, %v1490_v4, %v1484_v1 }
 0x577   : > { %1863 = vmatmul.mubr.msk.bf16.vlgmr.msra.gmra.mxu1 %vm511_vm1, %v1493_v2 }
 0x637   : > { %v1554_v0 = vpop.f32.mrf.mxu1 }
 0x638   : > { %v1555_v5 = vadd.f32 %v1770_v3, %v1554_v0 }
 0x639   : > { %v1864_v6 = vpop.f32.mrf.mxu1 }
 0x63a   : > { %1560 = vst.msk [vmem:[%s475_s18] sm:$0xff] %vm511_vm1, %v1555_v5 }
 0x63b   : > { %v1557_v7 = vpop.f32.mrf.mxu1 }
 0x63c   : > { %2152 = shalt.err (!%p2149_p1)
}
 0x63d   : > { %s2153_s4 = scalar_lea.hbm %s2712_s17, 128  ;;  %s2157_s23 = scalar_lea.hbm %s2810_s15, 256 }
 0x63e   : > { %p2154_p2 = scmp.ne.s32.totalorder %s2712_s17, %s2153_s4  ;;  %p2158_p12 = scmp.lt.s32.totalorder %s2712_s17, %s2810_s15 }
 0x63f   : > { %p2159_p9 = scmp.lt.s32.totalorder %s2157_s23, %s2153_s4 }
 0x640   : > { %p2155_p4 = pnand %p2154_p2, %p2346_p8 }
 0x641   : > { %p2160_p7 = por %p2159_p9, %p2158_p12 }
 0x642   : > { %p2156_p10 = pneg %p2155_p4 }
 0x644   : > { %p2161_p5 = pnand %p2160_p7, %p2156_p10 }
 0x646   : > { %2164 = shalt.err (!%p2161_p5)
}
 0x647   : > { %1880 = dma.vmem_to_hbm [thread:$0]  (%p2346_p8), %s2714_s12, 128, %s2712_s17, %s1562_s20   ;;  %v1865_v8 = vpop.f32.mrf.mxu1 }
 0x648 PF: > { %s2811_s25 = sld [smem:[#allocation20_spill]]  ;;  %p2814_p13 = scmp.ge.s32.totalorder %s2227_s10, 2 }
 0x649   : > { %s2812_s27 = sld [smem:[#allocation22_spill]] }
 0x64e   : > { %s1588_s21 = sand.u32 1, %s2811_s25  }
 0x64f   : > { %p2813_p11 = scmp.ne.s32.totalorder %s2812_s27, 0  ;;  %s1589_s1 = scalar_lea.sflag [#allocation8], %s1588_s21 }
 0x651   : > { %p1900_p3 = pnand %p2814_p13, %p2813_p11 }
 0x653   : > { %p1901_p0 = pneg %p1900_p3 }
 0x655   : > { %2202 = dma.done.wait (%p1901_p0), %s1589_s1, 128  }
 0x656   : > { %2204 = vsyncadd (%p1901_p0), %s1589_s1, 4294967168  ;;  %s28_s10 = sadd.s32 1, %s2227_s10   ;;  %s2815_s2 = sld [smem:[#allocation24_spill]] }
 0x657   : > { %p25_p6 = scmp.ge.s32.totalorder %s28_s10, 4   ;;  %s2816_s13 = sld [smem:[#allocation23_spill]] }
 0x658   : > { %s2817_s27 = smov %s2211_s28  ;;  %s2818_s28 = smov %s2215_s29 }
 0x659   : > { %s2820_s30 = smov %s2223_s9  ;;  %27 = sbr.rel (!%p25_p6) target bundleno = 15 (0xf), region = 140 }
 0x65c   : > { %s2819_s29 = smov %s2815_s2 }
 0x65d   : > { %s2821_s9 = smov %s2816_s13 }
 0x65e   :  { %1594 = vsyncpa [#allocation7], 1 }
 0x65f   :  { %1596 = vsyncpa [#allocation7 + $0x1], 1 }
 0x660   :  { %1597 = vsyncpa [#allocation10], 1 }
 0x661   :  { %1599 = vsyncpa [#allocation10 + $0x1], 1 }
 0x662   :  { %1600 = vsyncpa [#allocation13], 1 }
 0x663   :  { %1601 = vsyncpa [#allocation8], 1 }
 0x664   :  { %1603 = vsyncpa [#allocation8 + $0x1], 1 }

</bundles_post_ra>
